<compile_context>
chip_gen: v7x
topology: tpu7x:2x2x1
jax: 0.10.0
libtpu: 0.0.40
codegen_flags: <defaults>
</compile_context>

<pallas_src>
import functools

import jax
import jax.numpy as jnp
from jax import lax
from jax.experimental import pallas as pl
from jax.experimental.pallas import tpu as pltpu


O_PAD = 128  # classifier output padded to a full 128-lane tile


# ----------------------------------------------------------------------------
# Pallas kernels
# ----------------------------------------------------------------------------
def bilstm_layer_kernel(maxlen_ref, len_ref, x_ref, wih_ref, whh_f_ref, whh_b_ref,
                        b_ref, y_ref, xp_sc, hf_sc, cf_sc, hb_sc, cb_sc, *, B, H):
    """One bidirectional LSTM layer (both directions fused), time-major 2-D layout.

    maxlen_ref : SMEM (1,)        int32  max(sentence length)
    len_ref    : VMEM (B, 1)      int32  per-sequence lengths (padded rows = 0)
    x_ref      : VMEM (T*B, D)    layer input, row = t*B + b
    wih_ref    : VMEM (D, 8H)     [W_ih_fwd^T | W_ih_bwd^T]   (PyTorch gate order i,f,g,o)
    whh_*_ref  : VMEM (H, 4H)     per-direction recurrent weights (pre-transposed)
    b_ref      : VMEM (1, 8H)     [b_fwd | b_bwd], each = b_ih + b_hh
    y_ref      : VMEM (T*B, 2H)   output, lanes [0:H] fwd, [H:2H] bwd, zero at pads
    xp_sc      : VMEM (T*B, 8H)   scratch: precomputed input projections
    h*_sc/c*_sc: VMEM (B, H)      scratch: recurrent states
    """
    f32 = jnp.float32

    # ---- prologue: one big MXU matmul for both directions' input projections ----
    xp_sc[...] = (jnp.dot(x_ref[...], wih_ref[...], preferred_element_type=f32)
                  + b_ref[...])

    # pad_packed_sequence semantics: everything past each sequence's length is 0.
    y_ref[...] = jnp.zeros_like(y_ref)

    hf_sc[...] = jnp.zeros_like(hf_sc)
    cf_sc[...] = jnp.zeros_like(cf_sc)
    hb_sc[...] = jnp.zeros_like(hb_sc)
    cb_sc[...] = jnp.zeros_like(cb_sc)

    maxlen = maxlen_ref[0]
    lengths = len_ref[...]            # (B, 1), loop-invariant (hoisted)
    whh_f = whh_f_ref[...]            # (H, 4H), loop-invariant (hoisted)
    whh_b = whh_b_ref[...]

    def step(s, carry):
        t_f = s                       # forward time index
        t_b = maxlen - 1 - s          # backward time index
        off_f = pl.multiple_of(t_f * B, B)
        off_b = pl.multiple_of(t_b * B, B)

        hf = hf_sc[...]
        cf = cf_sc[...]
        hb = hb_sc[...]
        cb = cb_sc[...]

        gf = (xp_sc[pl.ds(off_f, B), 0:4 * H]
              + jnp.dot(hf, whh_f, preferred_element_type=f32))       # (B, 4H)
        gb = (xp_sc[pl.ds(off_b, B), 4 * H:8 * H]
              + jnp.dot(hb, whh_b, preferred_element_type=f32))       # (B, 4H)

        # forward direction gates (PyTorch order i, f, g, o)
        i_f = jax.nn.sigmoid(gf[:, 0 * H:1 * H])
        f_f = jax.nn.sigmoid(gf[:, 1 * H:2 * H])
        g_f = jnp.tanh(gf[:, 2 * H:3 * H])
        o_f = jax.nn.sigmoid(gf[:, 3 * H:4 * H])
        cf_new = f_f * cf + i_f * g_f
        hf_new = o_f * jnp.tanh(cf_new)

        # backward direction gates
        i_b = jax.nn.sigmoid(gb[:, 0 * H:1 * H])
        f_b = jax.nn.sigmoid(gb[:, 1 * H:2 * H])
        g_b = jnp.tanh(gb[:, 2 * H:3 * H])
        o_b = jax.nn.sigmoid(gb[:, 3 * H:4 * H])
        cb_new = f_b * cb + i_b * g_b
        hb_new = o_b * jnp.tanh(cb_new)

        # packed-sequence masking: state only advances while t < length
        valid_f = lengths > t_f       # (B, 1)
        valid_b = lengths > t_b

        hf_sc[...] = jnp.where(valid_f, hf_new, hf)
        cf_sc[...] = jnp.where(valid_f, cf_new, cf)
        hb_sc[...] = jnp.where(valid_b, hb_new, hb)
        cb_sc[...] = jnp.where(valid_b, cb_new, cb)

        y_ref[pl.ds(off_f, B), 0:H] = jnp.where(valid_f, hf_new,
                                                jnp.zeros_like(hf_new))
        y_ref[pl.ds(off_b, B), H:2 * H] = jnp.where(valid_b, hb_new,
                                                    jnp.zeros_like(hb_new))
        return carry

    # Only iterate over real timesteps (lengths sorted descending in forward()).
    lax.fori_loop(0, maxlen, step, 0)


def linear_logsoftmax_kernel(x_ref, w_ref, b_ref, o_ref):
    """o = log_softmax(x @ w + b, axis=-1).  x:(RB,2H) w:(2H,O_PAD) b:(1,O_PAD)."""
    logits = (jnp.dot(x_ref[...], w_ref[...], preferred_element_type=jnp.float32)
              + b_ref[...])
    m = jnp.max(logits, axis=-1, keepdims=True)
    s = logits - m
    lse = jnp.log(jnp.sum(jnp.exp(s), axis=-1, keepdims=True))
    o_ref[...] = s - lse


# ----------------------------------------------------------------------------
# Wrappers (glue)
# ----------------------------------------------------------------------------
def _vmem():
    return pl.BlockSpec(memory_space=pltpu.MemorySpace.VMEM)


def run_bilstm_layer(x_2d, maxlen, lengths_b1, wih, whh_f, whh_b, b):
    TB, _ = x_2d.shape
    B = lengths_b1.shape[0]
    H = whh_f.shape[0]
    kernel = functools.partial(bilstm_layer_kernel, B=B, H=H)
    return pl.pallas_call(
        kernel,
        out_shape=jax.ShapeDtypeStruct((TB, 2 * H), jnp.float32),
        in_specs=[
            pl.BlockSpec(memory_space=pltpu.MemorySpace.SMEM),   # maxlen (1,)
            _vmem(),                                             # lengths (B, 1)
            _vmem(),                                             # x (T*B, D)
            _vmem(),                                             # wih (D, 8H)
            _vmem(),                                             # whh_f (H, 4H)
            _vmem(),                                             # whh_b (H, 4H)
            _vmem(),                                             # bias (1, 8H)
        ],
        out_specs=_vmem(),
        scratch_shapes=[
            pltpu.VMEM((TB, 8 * H), jnp.float32),   # input projections
            pltpu.VMEM((B, H), jnp.float32),        # h fwd
            pltpu.VMEM((B, H), jnp.float32),        # c fwd
            pltpu.VMEM((B, H), jnp.float32),        # h bwd
            pltpu.VMEM((B, H), jnp.float32),        # c bwd
        ],
        compiler_params=pltpu.CompilerParams(
            vmem_limit_bytes=64 * 1024 * 1024),
    )(maxlen, lengths_b1, x_2d, wih, whh_f, whh_b, b)


def run_linear_logsoftmax(x, w, b, *, row_block=128):
    N, F = x.shape
    O = w.shape[1]
    n_pad = (-N) % row_block
    if n_pad:
        x = jnp.concatenate([x, jnp.zeros((n_pad, F), x.dtype)], axis=0)
    Np = N + n_pad
    out = pl.pallas_call(
        linear_logsoftmax_kernel,
        out_shape=jax.ShapeDtypeStruct((Np, O), jnp.float32),
        grid=(Np // row_block,),
        in_specs=[
            pl.BlockSpec((row_block, F), lambda i: (i, 0)),
            pl.BlockSpec((F, O), lambda i: (0, 0)),
            pl.BlockSpec((1, O), lambda i: (0, 0)),
        ],
        out_specs=pl.BlockSpec((row_block, O), lambda i: (i, 0)),
        compiler_params=pltpu.CompilerParams(
            dimension_semantics=("parallel",)),
    )(x, w, b)
    return out[:N]


def bilstm_tagger_forward(params, sentences_length, longest_sentence, xW):
    """REP='a' forward pass of BiLSTM_Tagger (eval mode)."""
    B, T = xW.shape
    assert T == longest_sentence
    H = params["H"]
    O = params["O"]

    # Pad batch to a multiple of 8 sublanes; padded rows get length 0 (fully masked).
    B_pad = -(-B // 8) * 8
    lengths = sentences_length.astype(jnp.int32)
    if B_pad != B:
        xW = jnp.concatenate(
            [xW, jnp.zeros((B_pad - B, T), xW.dtype)], axis=0)
        lengths = jnp.concatenate(
            [lengths, jnp.zeros((B_pad - B,), jnp.int32)], axis=0)
    lengths_b1 = lengths.reshape(B_pad, 1)
    maxlen = jnp.max(lengths, keepdims=True).astype(jnp.int32)   # (1,)

    # word_representation, REP='a': embedding gather, produced time-major directly
    # (transpose the small int id matrix instead of the embedded tensor).
    x = jnp.take(params["word_emb"], xW.T, axis=0)               # (T, B_pad, E)
    x2d = x.reshape(T * B_pad, -1)                               # row = t*B_pad + b

    # 2-layer bidirectional LSTM (packed semantics via length masking).
    for layer in range(2):
        lw = params[f"lstm_l{layer}"]
        x2d = run_bilstm_layer(x2d, maxlen, lengths_b1,
                               lw["wih"], lw["whh_f"], lw["whh_b"], lw["b"])
        # TODO(synk): nn.LSTM inter-layer dropout(0.5) and nn.Dropout() are
        #             training-time only; eval-mode forward treats them as identity.

    # dropout (identity, eval) -> linear1 -> log_softmax on time-major features.
    logp_pad = run_linear_logsoftmax(x2d, params["lin1_w_pad"], params["lin1_b_pad"])
    # (T*B_pad, O_PAD) -> (B, T, O), matching torch's batch-first view(-1, 2H) order.
    logp = logp_pad.reshape(T, B_pad, -1)[:, :B, :O]
    logp = jnp.transpose(logp, (1, 0, 2)).reshape(B * T, O)
    return logp


# ----------------------------------------------------------------------------
# Deterministic parameter init
# ----------------------------------------------------------------------------
def init_params(key, words_vocab_size, words_embedding_dim, bilstm_output_dim,
                output_size):
    E, H, O = words_embedding_dim, bilstm_output_dim, output_size
    keys = iter(jax.random.split(key, 64))
    params = {"H": H, "O": O}

    emb = jax.random.normal(next(keys), (words_vocab_size, E), jnp.float32)
    params["word_emb"] = emb.at[0].set(0.0)                  # padding_idx=0

    k = 1.0 / (H ** 0.5)
    for layer in range(2):
        d_in = E if layer == 0 else 2 * H

        def u(shape):
            return jax.random.uniform(next(keys), shape, jnp.float32, -k, k)

        wih_f = u((4 * H, d_in)); whh_f = u((4 * H, H))
        bih_f = u((4 * H,));      bhh_f = u((4 * H,))
        wih_b = u((4 * H, d_in)); whh_b = u((4 * H, H))
        bih_b = u((4 * H,));      bhh_b = u((4 * H,))
        params[f"lstm_l{layer}"] = {
            # fused input-projection weights: (d_in, 8H) = [fwd 4H | bwd 4H]
            "wih": jnp.concatenate([wih_f.T, wih_b.T], axis=1),
            "whh_f": whh_f.T,                                # (H, 4H)
            "whh_b": whh_b.T,                                # (H, 4H)
            "b": jnp.concatenate([bih_f + bhh_f, bih_b + bhh_b]).reshape(1, 8 * H),
        }

    kl = 1.0 / ((2 * H) ** 0.5)
    w1 = jax.random.uniform(next(keys), (O, 2 * H), jnp.float32, -kl, kl)
    b1 = jax.random.uniform(next(keys), (O,), jnp.float32, -kl, kl)
    # Pad classifier to 128 output lanes: zero weight columns, -1e30 bias on pads
    # so the padded logits contribute exp(.)=0 to the log-softmax denominator.
    params["lin1_w_pad"] = jnp.zeros((2 * H, O_PAD), jnp.float32).at[:, :O].set(w1.T)
    params["lin1_b_pad"] = jnp.full((1, O_PAD), -1e30, jnp.float32).at[0, :O].set(b1)
    return params


# ----------------------------------------------------------------------------
if __name__ == "__main__":
    # Small, module-consistent shapes.
    B, T = 4, 8                        # batch, longest_sentence
    words_vocab_size = 50
    words_embedding_dim = 32
    bilstm_output_dim = 32             # H  (bidirectional -> 2H = 64 features)
    tags_vocab_size = 17
    output_size = tags_vocab_size - 1  # 16

    key = jax.random.PRNGKey(0)
    k_par, k_x = jax.random.split(key)
    params = init_params(k_par, words_vocab_size, words_embedding_dim,
                         bilstm_output_dim, output_size)

    # enforce_sorted=True in forward -> lengths sorted descending.
    sentences_length = jnp.array([8, 6, 5, 3], dtype=jnp.int32)
    xW = jax.random.randint(k_x, (B, T), 1, words_vocab_size, dtype=jnp.int32)
    pad_mask = jnp.arange(T)[None, :] < sentences_length[:, None]
    xW = jnp.where(pad_mask, xW, 0)                          # padding_idx=0 at pads

    logp = bilstm_tagger_forward(params, sentences_length, T, xW)
    logp = jax.block_until_ready(logp)
    assert logp.shape == (B * T, output_size)
    print("KERNEL_OK")
</pallas_src>

<mosaic_0001>
module attributes {stable_mosaic.version = 11 : i64} {
  func.func @bilstm_layer_kernel(%arg0: memref<1xi32, #tpu.memory_space<smem>>, %arg1: memref<8x1xi32, #tpu.memory_space<vmem>>, %arg2: memref<64x32xf32, #tpu.memory_space<vmem>>, %arg3: memref<32x256xf32, #tpu.memory_space<vmem>>, %arg4: memref<32x128xf32, #tpu.memory_space<vmem>>, %arg5: memref<32x128xf32, #tpu.memory_space<vmem>>, %arg6: memref<1x256xf32, #tpu.memory_space<vmem>>, %arg7: memref<64x64xf32, #tpu.memory_space<vmem>>, %arg8: memref<64x256xf32, #tpu.memory_space<vmem>>, %arg9: memref<8x32xf32, #tpu.memory_space<vmem>>, %arg10: memref<8x32xf32, #tpu.memory_space<vmem>>, %arg11: memref<8x32xf32, #tpu.memory_space<vmem>>, %arg12: memref<8x32xf32, #tpu.memory_space<vmem>>) attributes {dimension_semantics = [], scalar_prefetch = 0 : i64, scratch_operands = 5 : i64, tpu.core_type = #tpu.core_type<tc>} {
    %c0 = arith.constant 0 : index
    %c0_0 = arith.constant 0 : index
    %0 = vector.load %arg2[%c0, %c0_0] : memref<64x32xf32, #tpu.memory_space<vmem>>, vector<64x32xf32>
    %c0_1 = arith.constant 0 : index
    %c0_2 = arith.constant 0 : index
    %1 = vector.load %arg3[%c0_1, %c0_2] : memref<32x256xf32, #tpu.memory_space<vmem>>, vector<32x256xf32>
    %cst = arith.constant dense<0.000000e+00> : vector<64x256xf32>
    %2 = tpu.matmul %0, %1, %cst {dimension_numbers = #tpu.dot_dimension_numbers<[1], [0], [0], [1], [0, 0, 1, 1], [], []>} : vector<64x32xf32>, vector<32x256xf32>, vector<64x256xf32> -> vector<64x256xf32>
    %c0_3 = arith.constant 0 : index
    %c0_4 = arith.constant 0 : index
    %3 = vector.load %arg6[%c0_3, %c0_4] : memref<1x256xf32, #tpu.memory_space<vmem>>, vector<1x256xf32>
    %4 = vector.broadcast %3 : vector<1x256xf32> to vector<64x256xf32>
    %5 = arith.addf %2, %4 : vector<64x256xf32>
    %c0_5 = arith.constant 0 : index
    %c0_6 = arith.constant 0 : index
    %6 = vector.load %arg8[%c0_5, %c0_6] : memref<64x256xf32, #tpu.memory_space<vmem>>, vector<64x256xf32>
    tpu.vector_store %arg8[%c0_5, %c0_6], %5 {strides = array<i32>} : memref<64x256xf32, #tpu.memory_space<vmem>>, vector<64x256xf32>,
    %cst_7 = arith.constant 0.000000e+00 : f32
    %7 = vector.broadcast %cst_7 : f32 to vector<64x64xf32>
    %c0_8 = arith.constant 0 : index
    %c0_9 = arith.constant 0 : index
    %8 = vector.load %arg7[%c0_8, %c0_9] : memref<64x64xf32, #tpu.memory_space<vmem>>, vector<64x64xf32>
    tpu.vector_store %arg7[%c0_8, %c0_9], %7 {strides = array<i32>} : memref<64x64xf32, #tpu.memory_space<vmem>>, vector<64x64xf32>,
    %cst_10 = arith.constant 0.000000e+00 : f32
    %9 = vector.broadcast %cst_10 : f32 to vector<8x32xf32>
    %c0_11 = arith.constant 0 : index
    %c0_12 = arith.constant 0 : index
    %10 = vector.load %arg9[%c0_11, %c0_12] : memref<8x32xf32, #tpu.memory_space<vmem>>, vector<8x32xf32>
    tpu.vector_store %arg9[%c0_11, %c0_12], %9 {strides = array<i32>} : memref<8x32xf32, #tpu.memory_space<vmem>>, vector<8x32xf32>,
    %cst_13 = arith.constant 0.000000e+00 : f32
    %11 = vector.broadcast %cst_13 : f32 to vector<8x32xf32>
    %c0_14 = arith.constant 0 : index
    %c0_15 = arith.constant 0 : index
    %12 = vector.load %arg10[%c0_14, %c0_15] : memref<8x32xf32, #tpu.memory_space<vmem>>, vector<8x32xf32>
    tpu.vector_store %arg10[%c0_14, %c0_15], %11 {strides = array<i32>} : memref<8x32xf32, #tpu.memory_space<vmem>>, vector<8x32xf32>,
    %cst_16 = arith.constant 0.000000e+00 : f32
    %13 = vector.broadcast %cst_16 : f32 to vector<8x32xf32>
    %c0_17 = arith.constant 0 : index
    %c0_18 = arith.constant 0 : index
    %14 = vector.load %arg11[%c0_17, %c0_18] : memref<8x32xf32, #tpu.memory_space<vmem>>, vector<8x32xf32>
    tpu.vector_store %arg11[%c0_17, %c0_18], %13 {strides = array<i32>} : memref<8x32xf32, #tpu.memory_space<vmem>>, vector<8x32xf32>,
    %cst_19 = arith.constant 0.000000e+00 : f32
    %15 = vector.broadcast %cst_19 : f32 to vector<8x32xf32>
    %c0_20 = arith.constant 0 : index
    %c0_21 = arith.constant 0 : index
    %16 = vector.load %arg12[%c0_20, %c0_21] : memref<8x32xf32, #tpu.memory_space<vmem>>, vector<8x32xf32>
    tpu.vector_store %arg12[%c0_20, %c0_21], %15 {strides = array<i32>} : memref<8x32xf32, #tpu.memory_space<vmem>>, vector<8x32xf32>,
    %c0_22 = arith.constant 0 : index
    %17 = memref.load %arg0[%c0_22] : memref<1xi32, #tpu.memory_space<smem>>
    %c0_23 = arith.constant 0 : index
    %c0_24 = arith.constant 0 : index
    %18 = vector.load %arg1[%c0_23, %c0_24] : memref<8x1xi32, #tpu.memory_space<vmem>>, vector<8x1xi32>
    %c0_25 = arith.constant 0 : index
    %c0_26 = arith.constant 0 : index
    %19 = vector.load %arg4[%c0_25, %c0_26] : memref<32x128xf32, #tpu.memory_space<vmem>>, vector<32x128xf32>
    %c0_27 = arith.constant 0 : index
    %c0_28 = arith.constant 0 : index
    %20 = vector.load %arg5[%c0_27, %c0_28] : memref<32x128xf32, #tpu.memory_space<vmem>>, vector<32x128xf32>
    %c0_i32 = arith.constant 0 : i32
    %c0_i32_29 = arith.constant 0 : i32
    %21 = arith.subi %17, %c0_i32_29 : i32
    %22 = arith.addi %c0_i32_29, %21 : i32
    %c1_i32 = arith.constant 1 : i32
    scf.for %arg13 = %c0_i32_29 to %22 step %c1_i32  : i32 {
      %c1_i32_30 = arith.constant 1 : i32
      %23 = arith.subi %17, %c1_i32_30 : i32
      %24 = arith.subi %23, %arg13 : i32
      %c8_i32 = arith.constant 8 : i32
      %25 = arith.muli %arg13, %c8_i32 : i32
      %26 = tpu.assume_multiple %25, 8 : i32
      %c8_i32_31 = arith.constant 8 : i32
      %27 = arith.muli %24, %c8_i32_31 : i32
      %28 = tpu.assume_multiple %27, 8 : i32
      %c0_32 = arith.constant 0 : index
      %c0_33 = arith.constant 0 : index
      %29 = vector.load %arg9[%c0_32, %c0_33] : memref<8x32xf32, #tpu.memory_space<vmem>>, vector<8x32xf32>
      %c0_34 = arith.constant 0 : index
      %c0_35 = arith.constant 0 : index
      %30 = vector.load %arg10[%c0_34, %c0_35] : memref<8x32xf32, #tpu.memory_space<vmem>>, vector<8x32xf32>
      %c0_36 = arith.constant 0 : index
      %c0_37 = arith.constant 0 : index
      %31 = vector.load %arg11[%c0_36, %c0_37] : memref<8x32xf32, #tpu.memory_space<vmem>>, vector<8x32xf32>
      %c0_38 = arith.constant 0 : index
      %c0_39 = arith.constant 0 : index
      %32 = vector.load %arg12[%c0_38, %c0_39] : memref<8x32xf32, #tpu.memory_space<vmem>>, vector<8x32xf32>
      %33 = arith.index_cast %26 : i32 to index
      %c0_40 = arith.constant 0 : index
      %34 = vector.load %arg8[%33, %c0_40] : memref<64x256xf32, #tpu.memory_space<vmem>>, vector<8x128xf32>
      %cst_41 = arith.constant dense<0.000000e+00> : vector<8x128xf32>
      %35 = tpu.matmul %29, %19, %cst_41 {dimension_numbers = #tpu.dot_dimension_numbers<[1], [0], [0], [1], [0, 0, 1, 1], [], []>} : vector<8x32xf32>, vector<32x128xf32>, vector<8x128xf32> -> vector<8x128xf32>
      %36 = arith.addf %34, %35 : vector<8x128xf32>
      %37 = arith.index_cast %28 : i32 to index
      %c128 = arith.constant 128 : index
      %38 = vector.load %arg8[%37, %c128] : memref<64x256xf32, #tpu.memory_space<vmem>>, vector<8x128xf32>
      %cst_42 = arith.constant dense<0.000000e+00> : vector<8x128xf32>
      %39 = tpu.matmul %31, %20, %cst_42 {dimension_numbers = #tpu.dot_dimension_numbers<[1], [0], [0], [1], [0, 0, 1, 1], [], []>} : vector<8x32xf32>, vector<32x128xf32>, vector<8x128xf32> -> vector<8x128xf32>
      %40 = arith.addf %38, %39 : vector<8x128xf32>
      %41 = vector.extract_strided_slice %36 {offsets = [0, 0], sizes = [8, 32], strides = [1, 1]} : vector<8x128xf32> to vector<8x32xf32>
      %42 = arith.negf %41 : vector<8x32xf32>
      %43 = math.exp %42 : vector<8x32xf32>
      %cst_43 = arith.constant 1.000000e+00 : f32
      %44 = vector.broadcast %cst_43 : f32 to vector<8x32xf32>
      %45 = arith.addf %44, %43 : vector<8x32xf32>
      %46 = arith.divf %44, %45 : vector<8x32xf32>
      %47 = vector.extract_strided_slice %36 {offsets = [0, 32], sizes = [8, 32], strides = [1, 1]} : vector<8x128xf32> to vector<8x32xf32>
      %48 = arith.negf %47 : vector<8x32xf32>
      %49 = math.exp %48 : vector<8x32xf32>
      %cst_44 = arith.constant 1.000000e+00 : f32
      %50 = vector.broadcast %cst_44 : f32 to vector<8x32xf32>
      %51 = arith.addf %50, %49 : vector<8x32xf32>
      %52 = arith.divf %50, %51 : vector<8x32xf32>
      %53 = vector.extract_strided_slice %36 {offsets = [0, 64], sizes = [8, 32], strides = [1, 1]} : vector<8x128xf32> to vector<8x32xf32>
      %54 = math.tanh %53 : vector<8x32xf32>
      %55 = vector.extract_strided_slice %36 {offsets = [0, 96], sizes = [8, 32], strides = [1, 1]} : vector<8x128xf32> to vector<8x32xf32>
      %56 = arith.negf %55 : vector<8x32xf32>
      %57 = math.exp %56 : vector<8x32xf32>
      %cst_45 = arith.constant 1.000000e+00 : f32
      %58 = vector.broadcast %cst_45 : f32 to vector<8x32xf32>
      %59 = arith.addf %58, %57 : vector<8x32xf32>
      %60 = arith.divf %58, %59 : vector<8x32xf32>
      %61 = arith.mulf %52, %30 : vector<8x32xf32>
      %62 = arith.mulf %46, %54 : vector<8x32xf32>
      %63 = arith.addf %61, %62 : vector<8x32xf32>
      %64 = math.tanh %63 : vector<8x32xf32>
      %65 = arith.mulf %60, %64 : vector<8x32xf32>
      %66 = vector.extract_strided_slice %40 {offsets = [0, 0], sizes = [8, 32], strides = [1, 1]} : vector<8x128xf32> to vector<8x32xf32>
      %67 = arith.negf %66 : vector<8x32xf32>
      %68 = math.exp %67 : vector<8x32xf32>
      %cst_46 = arith.constant 1.000000e+00 : f32
      %69 = vector.broadcast %cst_46 : f32 to vector<8x32xf32>
      %70 = arith.addf %69, %68 : vector<8x32xf32>
      %71 = arith.divf %69, %70 : vector<8x32xf32>
      %72 = vector.extract_strided_slice %40 {offsets = [0, 32], sizes = [8, 32], strides = [1, 1]} : vector<8x128xf32> to vector<8x32xf32>
      %73 = arith.negf %72 : vector<8x32xf32>
      %74 = math.exp %73 : vector<8x32xf32>
      %cst_47 = arith.constant 1.000000e+00 : f32
      %75 = vector.broadcast %cst_47 : f32 to vector<8x32xf32>
      %76 = arith.addf %75, %74 : vector<8x32xf32>
      %77 = arith.divf %75, %76 : vector<8x32xf32>
      %78 = vector.extract_strided_slice %40 {offsets = [0, 64], sizes = [8, 32], strides = [1, 1]} : vector<8x128xf32> to vector<8x32xf32>
      %79 = math.tanh %78 : vector<8x32xf32>
      %80 = vector.extract_strided_slice %40 {offsets = [0, 96], sizes = [8, 32], strides = [1, 1]} : vector<8x128xf32> to vector<8x32xf32>
      %81 = arith.negf %80 : vector<8x32xf32>
      %82 = math.exp %81 : vector<8x32xf32>
      %cst_48 = arith.constant 1.000000e+00 : f32
      %83 = vector.broadcast %cst_48 : f32 to vector<8x32xf32>
      %84 = arith.addf %83, %82 : vector<8x32xf32>
      %85 = arith.divf %83, %84 : vector<8x32xf32>
      %86 = arith.mulf %77, %32 : vector<8x32xf32>
      %87 = arith.mulf %71, %79 : vector<8x32xf32>
      %88 = arith.addf %86, %87 : vector<8x32xf32>
      %89 = math.tanh %88 : vector<8x32xf32>
      %90 = arith.mulf %85, %89 : vector<8x32xf32>
      %91 = vector.broadcast %arg13 : i32 to vector<8x1xi32>
      %92 = arith.cmpi sgt, %18, %91 : vector<8x1xi32>
      %93 = vector.broadcast %24 : i32 to vector<8x1xi32>
      %94 = arith.cmpi sgt, %18, %93 : vector<8x1xi32>
      %95 = vector.shape_cast %92 : vector<8x1xi1> to vector<8x1xi1>
      %96 = vector.broadcast %95 : vector<8x1xi1> to vector<8x32xi1>
      %97 = arith.select %96, %65, %29 : vector<8x32xi1>, vector<8x32xf32>
      %c0_49 = arith.constant 0 : index
      %c0_50 = arith.constant 0 : index
      %98 = vector.load %arg9[%c0_49, %c0_50] : memref<8x32xf32, #tpu.memory_space<vmem>>, vector<8x32xf32>
      tpu.vector_store %arg9[%c0_49, %c0_50], %97 {strides = array<i32>} : memref<8x32xf32, #tpu.memory_space<vmem>>, vector<8x32xf32>,
      %99 = vector.shape_cast %92 : vector<8x1xi1> to vector<8x1xi1>
      %100 = vector.broadcast %99 : vector<8x1xi1> to vector<8x32xi1>
      %101 = arith.select %100, %63, %30 : vector<8x32xi1>, vector<8x32xf32>
      %c0_51 = arith.constant 0 : index
      %c0_52 = arith.constant 0 : index
      %102 = vector.load %arg10[%c0_51, %c0_52] : memref<8x32xf32, #tpu.memory_space<vmem>>, vector<8x32xf32>
      tpu.vector_store %arg10[%c0_51, %c0_52], %101 {strides = array<i32>} : memref<8x32xf32, #tpu.memory_space<vmem>>, vector<8x32xf32>,
      %103 = vector.shape_cast %94 : vector<8x1xi1> to vector<8x1xi1>
      %104 = vector.broadcast %103 : vector<8x1xi1> to vector<8x32xi1>
      %105 = arith.select %104, %90, %31 : vector<8x32xi1>, vector<8x32xf32>
      %c0_53 = arith.constant 0 : index
      %c0_54 = arith.constant 0 : index
      %106 = vector.load %arg11[%c0_53, %c0_54] : memref<8x32xf32, #tpu.memory_space<vmem>>, vector<8x32xf32>
      tpu.vector_store %arg11[%c0_53, %c0_54], %105 {strides = array<i32>} : memref<8x32xf32, #tpu.memory_space<vmem>>, vector<8x32xf32>,
      %107 = vector.shape_cast %94 : vector<8x1xi1> to vector<8x1xi1>
      %108 = vector.broadcast %107 : vector<8x1xi1> to vector<8x32xi1>
      %109 = arith.select %108, %88, %32 : vector<8x32xi1>, vector<8x32xf32>
      %c0_55 = arith.constant 0 : index
      %c0_56 = arith.constant 0 : index
      %110 = vector.load %arg12[%c0_55, %c0_56] : memref<8x32xf32, #tpu.memory_space<vmem>>, vector<8x32xf32>
      tpu.vector_store %arg12[%c0_55, %c0_56], %109 {strides = array<i32>} : memref<8x32xf32, #tpu.memory_space<vmem>>, vector<8x32xf32>,
      %cst_57 = arith.constant 0.000000e+00 : f32
      %111 = vector.broadcast %cst_57 : f32 to vector<8x32xf32>
      %112 = vector.shape_cast %92 : vector<8x1xi1> to vector<8x1xi1>
      %113 = vector.broadcast %112 : vector<8x1xi1> to vector<8x32xi1>
      %114 = arith.select %113, %65, %111 : vector<8x32xi1>, vector<8x32xf32>
      %115 = arith.index_cast %26 : i32 to index
      %c0_58 = arith.constant 0 : index
      %116 = vector.load %arg7[%115, %c0_58] : memref<64x64xf32, #tpu.memory_space<vmem>>, vector<8x32xf32>
      tpu.vector_store %arg7[%115, %c0_58], %114 {strides = array<i32>} : memref<64x64xf32, #tpu.memory_space<vmem>>, vector<8x32xf32>,
      %cst_59 = arith.constant 0.000000e+00 : f32
      %117 = vector.broadcast %cst_59 : f32 to vector<8x32xf32>
      %118 = vector.shape_cast %94 : vector<8x1xi1> to vector<8x1xi1>
      %119 = vector.broadcast %118 : vector<8x1xi1> to vector<8x32xi1>
      %120 = arith.select %119, %90, %117 : vector<8x32xi1>, vector<8x32xf32>
      %121 = arith.index_cast %28 : i32 to index
      %c32 = arith.constant 32 : index
      %122 = vector.load %arg7[%121, %c32] : memref<64x64xf32, #tpu.memory_space<vmem>>, vector<8x32xf32>
      tpu.vector_store %arg7[%121, %c32], %120 {strides = array<i32>} : memref<64x64xf32, #tpu.memory_space<vmem>>, vector<8x32xf32>,
    }
    return
  }
}

</mosaic_0001>

<bundles_post_ra>
// kernel: tpu_custom_call.1
= control target key start
LH: loop header
LB: loop body
LE: loop exit
PB: predicated region body
PF: predicated region fallthrough
CT: control target
= control target key end

     0   :  { %13 = vsyncpa [#allocation9], 0  ;;  %s1182_s0 = inlined_call_operand.<no memory space> [shape: s32[1], index: 0, kind: input, shape index: {}]   ;;  %s1183_s1 = inlined_call_operand.hbm [shape: s32[8,1], index: 1, kind: input, shape index: {}]   ;;  %s1184_s2 = inlined_call_operand.hbm [shape: f32[64,32], index: 2, kind: input, shape index: {}]   ;;  %s1185_s3 = inlined_call_operand.hbm [shape: f32[32,256], index: 3, kind: input, shape index: {}]   ;;  %s1186_s4 = inlined_call_operand.hbm [shape: f32[32,128], index: 4, kind: input, shape index: {}]   ;;  %s1187_s5 = inlined_call_operand.hbm [shape: f32[32,128], index: 5, kind: input, shape index: {}]   ;;  %s1188_s6 = inlined_call_operand.hbm [shape: f32[1,256], index: 6, kind: input, shape index: {}]   ;;  %s1189_s7 = inlined_call_operand.hbm [shape: f32[64,64], index: 7, kind: output, shape index: {}]  }
   0x1   :  { %14 = vsyncpa [#allocation12], 0 }
   0x2   :  { %15 = vsyncpa [#allocation15], 0 }
   0x3   :  { %16 = vsyncpa [#allocation18], 0 }
   0x4   :  { %17 = vsyncpa [#allocation10], 0  ;;  %s928_s24 = smov [#allocation11]   ;;  %s756_s28 = scalar_lea.hbm %s1184_s2, 1024 }
   0x5   :  { %s35_s25 = sshll.u32 %s928_s24, 4  ;;  %p757_p0 = scmp.ne.s32.totalorder %s1184_s2, %s756_s28  ;;  %s36_s25 = int_to_ptr.vmem [resolvable:$true] %s35_s25 }
   0x6   :  { %p760_p1 = scmp.lt.u32.totalorder %s756_s28, %s1184_s2 }
   0x8   :  { %p762_p2 = pnand %p760_p1, %p757_p0 }
   0xa   :  { %765 = shalt.err (!%p762_p2)
}
   0xb   :  { %s766_s10 = scalar_lea.vmem %s36_s25, 1024  ;;  %p771_p4 = scmp.lt.s32.totalorder %s36_s25, %s36_s25 }
   0xc   :  { %p767_p3 = scmp.ne.s32.totalorder %s36_s25, %s766_s10  ;;  %p772_p5 = scmp.lt.s32.totalorder %s766_s10, %s766_s10 }
   0xe   :  { %p773_p6 = por %p772_p5, %p771_p4 }
  0x10   :  { %p774_p7 = pnand %p773_p6, %p767_p3 }
  0x12   :  { %777 = shalt.err (!%p774_p7)
}
  0x13   :  { %s929_s11 = smov 128   ;;  %s930_s12 = smov 8  }
  0x14   :  { %41 = dma.hbm_to_vmem [thread:$0]  %s1184_s2, 1024, %s36_s25, [#allocation12], %s929_s11, %s929_s11, %s930_s12  }
  0x15   :  { %s931_s15 = smov [#allocation14]   ;;  %s932_s17 = smov [#allocation8]  }
  0x16   :  { %s59_s16 = sshll.u32 %s931_s15, 4  ;;  %s26_s18 = sshll.u32 %s932_s17, 4  ;;  %s60_s16 = int_to_ptr.vmem [resolvable:$true] %s59_s16  ;;  %s27_s18 = int_to_ptr.vmem [resolvable:$true] %s26_s18 }
  0x17   :  { %s778_s21 = scalar_lea.hbm %s1186_s4, 512 }
  0x18   :  { %p779_p8 = scmp.ne.s32.totalorder %s1186_s4, %s778_s21  ;;  %p782_p9 = scmp.lt.u32.totalorder %s778_s21, %s1186_s4 }
  0x1a   :  { %p784_p10 = pnand %p782_p9, %p779_p8 }
  0x1c   :  { %787 = shalt.err (!%p784_p10)
}
  0x1d   :  { %s788_s2 = scalar_lea.vmem %s60_s16, 512  ;;  %p793_p12 = scmp.lt.s32.totalorder %s60_s16, %s60_s16 }
  0x1e   :  { %p789_p11 = scmp.ne.s32.totalorder %s60_s16, %s788_s2  ;;  %p794_p13 = scmp.lt.s32.totalorder %s788_s2, %s788_s2 }
  0x20   :  { %p795_p0 = por %p794_p13, %p793_p12 }
  0x22   :  { %p796_p1 = pnand %p795_p0, %p789_p11 }
  0x24   :  { %799 = shalt.err (!%p796_p1)
}
  0x25   :  { %65 = dma.hbm_to_vmem [thread:$0]  %s1186_s4, 512, %s60_s16, [#allocation15], %s929_s11, %s929_s11, %s930_s12  }
  0x26   :  { %s800_s30 = scalar_lea.hbm %s1183_s1, 128 }
  0x27   :  { %p801_p2 = scmp.ne.s32.totalorder %s1183_s1, %s800_s30  ;;  %p804_p3 = scmp.lt.u32.totalorder %s800_s30, %s1183_s1 }
  0x29   :  { %p806_p4 = pnand %p804_p3, %p801_p2 }
  0x2b   :  { %809 = shalt.err (!%p806_p4)
}
  0x2c   :  { %s810_s14 = scalar_lea.vmem %s27_s18, 128  ;;  %p815_p6 = scmp.lt.s32.totalorder %s27_s18, %s27_s18 }
  0x2d   :  { %p811_p5 = scmp.ne.s32.totalorder %s27_s18, %s810_s14  ;;  %p816_p7 = scmp.lt.s32.totalorder %s810_s14, %s810_s14 }
  0x2f   :  { %p817_p8 = por %p816_p7, %p815_p6 }
  0x31   :  { %p818_p9 = pnand %p817_p8, %p811_p5 }
  0x33   :  { %821 = shalt.err (!%p818_p9)
}
  0x34   :  { %29 = dma.hbm_to_vmem [thread:$0]  %s1183_s1, 128, %s27_s18, [#allocation9]  }
  0x35   :  { %s933_s16 = smov [#allocation13]   ;;  %s822_s21 = scalar_lea.hbm %s1185_s3, 1024 }
  0x36   :  { %s47_s17 = sshll.u32 %s933_s16, 4  ;;  %p823_p10 = scmp.ne.s32.totalorder %s1185_s3, %s822_s21  ;;  %s48_s17 = int_to_ptr.vmem [resolvable:$true] %s47_s17 }
  0x37   :  { %p826_p11 = scmp.lt.u32.totalorder %s822_s21, %s1185_s3 }
  0x39   :  { %p828_p12 = pnand %p826_p11, %p823_p10 }
  0x3b   :  { %831 = shalt.err (!%p828_p12)
}
  0x3c   :  { %s832_s2 = scalar_lea.vmem %s48_s17, 1024  ;;  %p837_p0 = scmp.lt.s32.totalorder %s48_s17, %s48_s17 }
  0x3d   :  { %p833_p13 = scmp.ne.s32.totalorder %s48_s17, %s832_s2  ;;  %p838_p1 = scmp.lt.s32.totalorder %s832_s2, %s832_s2 }
  0x3f   :  { %p839_p2 = por %p838_p1, %p837_p0 }
  0x41   :  { %p840_p3 = pnand %p839_p2, %p833_p13 }
  0x43   :  { %843 = shalt.err (!%p840_p3)
}
  0x44   :  { %s934_s1 = smov 256   ;;  %s935_s18 = smov 16  }
  0x45   :  { %53 = dma.hbm_to_vmem [thread:$0]  %s1185_s3, 1024, %s48_s17, [#allocation12], %s934_s1, %s934_s1, %s935_s18  }
  0x46   :  { %s936_s28 = smov [#allocation16]   ;;  %s937_s30 = smov [#allocation17]  }
  0x47   :  { %s71_s29 = sshll.u32 %s936_s28, 4  ;;  %s84_s8 = sshll.u32 %s937_s30, 4  ;;  %s72_s29 = int_to_ptr.vmem [resolvable:$true] %s71_s29  ;;  %s85_s8 = int_to_ptr.vmem [resolvable:$true] %s84_s8 }
  0x48   :  { %s844_s13 = scalar_lea.hbm %s1187_s5, 512 }
  0x49   :  { %p845_p4 = scmp.ne.s32.totalorder %s1187_s5, %s844_s13  ;;  %p848_p5 = scmp.lt.u32.totalorder %s844_s13, %s1187_s5 }
  0x4b   :  { %p850_p6 = pnand %p848_p5, %p845_p4 }
  0x4d   :  { %853 = shalt.err (!%p850_p6)
}
  0x4e   :  { %s854_s3 = scalar_lea.vmem %s72_s29, 512  ;;  %p859_p8 = scmp.lt.s32.totalorder %s72_s29, %s72_s29 }
  0x4f   :  { %p855_p7 = scmp.ne.s32.totalorder %s72_s29, %s854_s3  ;;  %p860_p9 = scmp.lt.s32.totalorder %s854_s3, %s854_s3 }
  0x51   :  { %p861_p10 = por %p860_p9, %p859_p8 }
  0x53   :  { %p862_p11 = pnand %p861_p10, %p855_p7 }
  0x55   :  { %865 = shalt.err (!%p862_p11)
}
  0x56   :  { %77 = dma.hbm_to_vmem [thread:$0]  %s1187_s5, 512, %s72_s29, [#allocation15], %s929_s11, %s929_s11, %s930_s12  }
  0x57   :  { %s866_s22 = scalar_lea.hbm %s1188_s6, 32 }
  0x58   :  { %p867_p12 = scmp.ne.s32.totalorder %s1188_s6, %s866_s22  ;;  %p870_p13 = scmp.lt.u32.totalorder %s866_s22, %s1188_s6 }
  0x5a   :  { %p872_p0 = pnand %p870_p13, %p867_p12 }
  0x5c   :  { %875 = shalt.err (!%p872_p0)
}
  0x5d   :  { %s876_s1 = scalar_lea.vmem %s85_s8, 32  ;;  %p881_p2 = scmp.lt.s32.totalorder %s85_s8, %s85_s8 }
  0x5e   :  { %p877_p1 = scmp.ne.s32.totalorder %s85_s8, %s876_s1  ;;  %p882_p3 = scmp.lt.s32.totalorder %s876_s1, %s876_s1 }
  0x60   :  { %p883_p4 = por %p882_p3, %p881_p2 }
  0x62   :  { %p884_p5 = pnand %p883_p4, %p877_p1 }
  0x64   :  { %887 = shalt.err (!%p884_p5)
}
  0x65   :  { %87 = dma.hbm_to_vmem [thread:$0]  %s1188_s6, 32, %s85_s8, [#allocation18]  }
  0x66   :  { %914 = dma.done.wait [#allocation9], 128  }
  0x67   :  { %915 = vsyncadd [#allocation9], 4294967168 }
  0x68   :  { %916 = dma.done.wait [#allocation12], 2048  }
  0x69   :  { %917 = vsyncadd [#allocation12], 4294965248 }
  0x6a   :  { %918 = dma.done.wait [#allocation15], 1024  }
  0x6b   :  { %919 = vsyncadd [#allocation15], 4294966272 }
  0x6c   :  { %920 = dma.done.wait [#allocation18], 32  }
  0x6d   :  { %921 = vsyncadd [#allocation18], 4294967264  ;;  %vm288_vm0 = vcmask 523264   ;;  %vm134_vm1 = vcmask 261120   ;;  %v938_v0 = vmov 0.0   ;;  %v1072_v1 = vld [vmem:[#allocation8] sm:$0xff]  ;;  %v124_v30 = vlaneseq }
  0x6e   :  { %223 = vmatprep.mubr.f32.mxu0 %v938_v0  ;;  %289 = vst.msk [vmem:[#allocation19] sm:$0xff] %vm288_vm0, %v938_v0  ;;  %290 = vst.msk [vmem:[#allocation19 + $0x8] sm:$0xff] %vm288_vm0, %v938_v0  ;;  %247 = vmatprep.mubr.f32.mxu1 %v938_v0  ;;  %v1074_v2 = vld [vmem:[#allocation14] sm:$0xff]  ;;  %v1076_v3 = vld [vmem:[#allocation14 + $0x8] sm:$0xff]  ;;  %p641_p6 = scmp.le.s32.totalorder %s1182_s0, 0 }
  0x6f   :  { %291 = vst.msk [vmem:[#allocation19 + $0x10] sm:$0xff] %vm288_vm0, %v938_v0  ;;  %292 = vst.msk [vmem:[#allocation19 + $0x18] sm:$0xff] %vm288_vm0, %v938_v0  ;;  %v1078_v4 = vld [vmem:[#allocation14 + $0x10] sm:$0xff]  ;;  %v1080_v5 = vld [vmem:[#allocation14 + $0x18] sm:$0xff]  ;;  %v125_v31 = vshrl.u32 %v124_v30, 7  ;;  %s1101_s27 = smov (!%p641_p6), 0  }
  0x70   :  { %293 = vst.msk [vmem:[#allocation19 + $0x20] sm:$0xff] %vm288_vm0, %v938_v0  ;;  %294 = vst.msk [vmem:[#allocation19 + $0x28] sm:$0xff] %vm288_vm0, %v938_v0  ;;  %v1082_v6 = vld [vmem:[#allocation16] sm:$0xff]  ;;  %v1084_v7 = vld [vmem:[#allocation16 + $0x8] sm:$0xff] }
  0x71   :  { %295 = vst.msk [vmem:[#allocation19 + $0x30] sm:$0xff] %vm288_vm0, %v938_v0  ;;  %296 = vst.msk [vmem:[#allocation19 + $0x38] sm:$0xff] %vm288_vm0, %v938_v0  ;;  %v1086_v8 = vld [vmem:[#allocation16 + $0x10] sm:$0xff]  ;;  %v1088_v9 = vld [vmem:[#allocation16 + $0x18] sm:$0xff]  ;;  %v126_v32 = vsub.s32 0, %v125_v31  ;;  %v130_v34 = vsub.s32 1, %v125_v31 }
  0x72   :  { %297 = vst.msk [vmem:[#allocation3] sm:$0xff] %vm134_vm1, %v938_v0  ;;  %298 = vst.msk [vmem:[#allocation4] sm:$0xff] %vm134_vm1, %v938_v0  ;;  %v115_v10 = vld [vmem:[#allocation13 + $0x8] sm:$0xff]  ;;  %v117_v11 = vld [vmem:[#allocation13 + $0x18] sm:$0xff] }
  0x73   :  { %299 = vst.msk [vmem:[#allocation5] sm:$0xff] %vm134_vm1, %v938_v0  ;;  %300 = vst.msk [vmem:[#allocation6] sm:$0xff] %vm134_vm1, %v938_v0  ;;  %v114_v12 = vld [vmem:[#allocation13] sm:$0xff]  ;;  %v687_v13 = vpack.c.bf16 %v117_v11, %v115_v10  ;;  %v116_v14 = vld [vmem:[#allocation13 + $0x10] sm:$0xff] }
  0x74   :  { %v119_v15 = vld [vmem:[#allocation13 + $0x28] sm:$0xff]  ;;  %v121_v16 = vld [vmem:[#allocation13 + $0x38] sm:$0xff]  ;;  %v689_v17 = vpack.c.bf16 %v116_v14, %v114_v12  ;;  %v118_v19 = vld [vmem:[#allocation13 + $0x20] sm:$0xff] }
  0x75   :  { %v691_v18 = vpack.c.bf16 %v121_v16, %v119_v15  ;;  %v120_v20 = vld [vmem:[#allocation13 + $0x30] sm:$0xff]  ;;  %688 = vmatprep.subr.bf16.mxu0 %v687_v13  ;;  %707 = vmatprep.subr.bf16.mxu1 %v687_v13  ;;  %v106_v22 = vld [vmem:[#allocation11] sm:$0xff]  ;;  %v107_v24 = vld [vmem:[#allocation11 + $0x8] sm:$0xff] }
  0x76   :  { %690 = vmatpush1.bf16.msra.mxu0 %v689_v17  ;;  %709 = vmatpush1.bf16.msra.mxu1 %v689_v17  ;;  %v693_v21 = vpack.c.bf16 %v120_v20, %v118_v19  ;;  %v110_v23 = vld [vmem:[#allocation11 + $0x20] sm:$0xff]  ;;  %v111_v25 = vld [vmem:[#allocation11 + $0x28] sm:$0xff]  ;;  %v108_v26 = vld [vmem:[#allocation11 + $0x10] sm:$0xff] }
  0x77   :  { %692 = vmatprep.subr.bf16.mxu0 %v691_v18  ;;  %708 = vmatprep.subr.bf16.mxu1 %v691_v18  ;;  %v112_v27 = vld [vmem:[#allocation11 + $0x30] sm:$0xff]  ;;  %v109_v28 = vld [vmem:[#allocation11 + $0x18] sm:$0xff]  ;;  %v122_v33 = vld [vmem:[#allocation17] sm:$0x3] }
  0x78   :  { %v113_v29 = vld [vmem:[#allocation11 + $0x38] sm:$0xff]  ;;  %v127_v35 = vrot.slane %v122_v33, %v126_v32  ;;  %v131_v36 = vrot.slane %v122_v33, %v130_v34 }
  0x7a   :  { %694 = vmatpush1.bf16.msra.mxu0 %v693_v21  ;;  %710 = vmatpush1.bf16.msra.mxu1 %v693_v21 }
  0x7d   :  { %633 = vmatmul.mubr.msk.f32.vlgmr.msra.gmra.mrb[0].mxu0 %vm134_vm1, %v106_v22  ;;  %637 = vmatmul.mubr.msk.f32.vlgmr.msra.gmra.mrb[0].mxu1 %vm134_vm1, %v110_v23 }
  0x7e   :  { %229 = vmatprep.mubr.f32.mxu0 %v938_v0  ;;  %253 = vmatprep.mubr.f32.mxu1 %v938_v0 }
  0x81   :  { %634 = vmatmul.mubr.msk.f32.gmra.mrb[2].mxu0 %vm134_vm1, %v107_v24  ;;  %638 = vmatmul.mubr.msk.f32.gmra.mrb[2].mxu1 %vm134_vm1, %v111_v25 }
  0x82   :  { %235 = vmatprep.mubr.f32.mxu0 %v938_v0  ;;  %259 = vmatprep.mubr.f32.mxu1 %v938_v0 }
  0x85   :  { %635 = vmatmul.mubr.msk.f32.gmra.mrb[4].mxu0 %vm134_vm1, %v108_v26  ;;  %639 = vmatmul.mubr.msk.f32.gmra.mrb[4].mxu1 %vm134_vm1, %v112_v27 }
  0x86   :  { %241 = vmatprep.mubr.f32.mxu0 %v938_v0  ;;  %265 = vmatprep.mubr.f32.mxu1 %v938_v0 }
  0x89   :  { %636 = vmatmul.mubr.msk.f32.gmra.mrb[6].mxu0 %vm134_vm1, %v109_v28  ;;  %640 = vmatmul.mubr.msk.f32.gmra.mrb[6].mxu1 %vm134_vm1, %v113_v29 }
 0x150   :  { %v225_v37 = vpop.f32.mrb[0].mxu0  ;;  %v249_v38 = vpop.f32.mrb[0].mxu1 }
 0x151   :  { %v226_v39 = vadd.f32 %v225_v37, %v127_v35  ;;  %v250_v40 = vadd.f32 %v249_v38, %v127_v35  ;;  %v227_v41 = vpop.f32.mrb[1].mxu0  ;;  %v251_v42 = vpop.f32.mrb[1].mxu1 }
 0x152   :  { %v228_v43 = vadd.f32 %v227_v41, %v131_v36  ;;  %v252_v44 = vadd.f32 %v251_v42, %v131_v36 }
 0x153   :  { %272 = vst [vmem:[#allocation2] sm:$0xff] %v226_v39  ;;  %280 = vst [vmem:[#allocation2 + $0x40] sm:$0xff] %v250_v40 }
 0x154   :  { %273 = vst [vmem:[#allocation2 + $0x8] sm:$0xff] %v228_v43  ;;  %281 = vst [vmem:[#allocation2 + $0x48] sm:$0xff] %v252_v44  ;;  %v231_v45 = vpop.f32.mrb[2].mxu0  ;;  %v255_v46 = vpop.f32.mrb[2].mxu1 }
 0x155   :  { %v232_v47 = vadd.f32 %v231_v45, %v127_v35  ;;  %v256_v48 = vadd.f32 %v255_v46, %v127_v35  ;;  %v233_v49 = vpop.f32.mrb[3].mxu0  ;;  %v257_v50 = vpop.f32.mrb[3].mxu1 }
 0x156   :  { %v234_v51 = vadd.f32 %v233_v49, %v131_v36  ;;  %v258_v52 = vadd.f32 %v257_v50, %v131_v36 }
 0x157   :  { %274 = vst [vmem:[#allocation2 + $0x10] sm:$0xff] %v232_v47  ;;  %282 = vst [vmem:[#allocation2 + $0x50] sm:$0xff] %v256_v48 }
 0x158   :  { %275 = vst [vmem:[#allocation2 + $0x18] sm:$0xff] %v234_v51  ;;  %283 = vst [vmem:[#allocation2 + $0x58] sm:$0xff] %v258_v52  ;;  %v237_v53 = vpop.f32.mrb[4].mxu0  ;;  %v261_v54 = vpop.f32.mrb[4].mxu1 }
 0x159   :  { %v238_v55 = vadd.f32 %v237_v53, %v127_v35  ;;  %v262_v56 = vadd.f32 %v261_v54, %v127_v35  ;;  %v239_v57 = vpop.f32.mrb[5].mxu0  ;;  %v263_v58 = vpop.f32.mrb[5].mxu1 }
 0x15a   :  { %v240_v59 = vadd.f32 %v239_v57, %v131_v36  ;;  %v264_v60 = vadd.f32 %v263_v58, %v131_v36  ;;  %630 = sbr.rel (%p641_p6) target bundleno = 1080 (0x438), region = 77 }
 0x15b   :  { %276 = vst [vmem:[#allocation2 + $0x20] sm:$0xff] %v238_v55  ;;  %284 = vst [vmem:[#allocation2 + $0x60] sm:$0xff] %v262_v56 }
 0x15c   :  { %277 = vst [vmem:[#allocation2 + $0x28] sm:$0xff] %v240_v59  ;;  %285 = vst [vmem:[#allocation2 + $0x68] sm:$0xff] %v264_v60  ;;  %v243_v61 = vpop.f32.mrb[6].mxu0  ;;  %v267_v62 = vpop.f32.mrb[6].mxu1 }
 0x15d   :  { %v244_v63 = vadd.f32 %v243_v61, %v127_v35  ;;  %v268_v0 = vadd.f32 %v267_v62, %v127_v35  ;;  %v245_v10 = vpop.f32.mrb[7].mxu0  ;;  %v269_v11 = vpop.f32.mrb[7].mxu1 }
 0x15e   :  { %v246_v12 = vadd.f32 %v245_v10, %v131_v36  ;;  %v270_v13 = vadd.f32 %v269_v11, %v131_v36 }
 0x15f   :  { %278 = vst [vmem:[#allocation2 + $0x30] sm:$0xff] %v244_v63  ;;  %286 = vst [vmem:[#allocation2 + $0x70] sm:$0xff] %v268_v0 }
 0x160   :  { %279 = vst [vmem:[#allocation2 + $0x38] sm:$0xff] %v246_v12  ;;  %287 = vst [vmem:[#allocation2 + $0x78] sm:$0xff] %v270_v13 }
 0x161 LB: > { %v696_v14 = vpack.c.bf16 %v1076_v3, %v1074_v2  ;;  %v702_v15 = vpack.c.bf16 %v1084_v7, %v1082_v6  ;;  %v939_v16 = vmov 0.0|0.0   ;;  %v699_v17 = vpack.c.bf16 %v1080_v5, %v1078_v4  ;;  %v322_v19 = vld [vmem:[#allocation4] sm:$0xff]  ;;  %s942_s28 = smov 32   ;;  %v1115_v21 = vld [vmem:[#allocation3] sm:$0xff]  ;;  %v1117_v22 = vld [vmem:[#allocation5] sm:$0xff]  ;;  %s642_s8 = sadd.s32 4294967295, %s1182_s0  ;;  %s926_s27 = sphi %s1101_s27, %s314_s27  }
 0x162   : > { %695 = vmatprep.subr.bf16.mxu0 %v939_v16  ;;  %701 = vmatprep.subr.bf16.mxu1 %v939_v16  ;;  %v705_v18 = vpack.c.bf16 %v1088_v9, %v1086_v8  ;;  %vm940_vm2 = vmmov 0   ;;  %v941_v20 = vmov 0.0   ;;  %v324_v23 = vld [vmem:[#allocation6] sm:$0xff]  ;;  %s1128_s9 = ssub.s32 %s642_s8, %s926_s27  ;;  %s643_s10 = sshll.u32 %s926_s27, 3  ;;  %v943_v32 = vmov 0  }
 0x163   : > { %697 = vmatpush3.bf16.msra.mxu0 %v696_v14  ;;  %703 = vmatpush3.bf16.msra.mxu1 %v702_v15  ;;  %s644_s13 = sshll.u32 %s1128_s9, 3  ;;  %s325_s14 = sshra.s32 %s643_s10, 3  ;;  %v541_v41 = vstv %s926_s27  ;;  %v543_v45 = vstv %s1128_s9  ;;  %vm598_vm7 = vcmask 523520  }
 0x164   : > { %698 = vmatprep.subr.bf16.mxu0 %v939_v16  ;;  %673 = vmatprep.mubr.msk.f32.mxu0 %vm940_vm2, %v941_v20  ;;  %s405_s4 = sshra.s32 %s644_s13, 3  ;;  %s653_s15 = sshll.u32 %s325_s14, 4  ;;  %vm542_vm3 = vcmp.gt.s32.totalorder %v1072_v1, %v541_v41  ;;  %vm544_vm4 = vcmp.gt.s32.totalorder %v1072_v1, %v543_v45 }
 0x165   : > { %704 = vmatprep.subr.bf16.mxu1 %v939_v16  ;;  %684 = vmatprep.mubr.msk.f32.mxu1 %vm940_vm2, %v941_v20  ;;  %s654_s16 = sshll.u32 %s405_s4, 4  ;;  %s329_s3 = scalar_lea.vmem [#allocation2], %s653_s15  ;;  %v545_v48 = vsel %vm542_vm3, 1, %v943_v32  ;;  %v565_v50 = vsel %vm544_vm4, 1, %v943_v32 }
 0x166   : > { %493 = vrot.lane.b32.xlu1 %v322_v19, %s942_s28  ;;  %s409_s17 = scalar_lea.vmem [#allocation2], %s654_s16  ;;  %738 = vset.pattern.permute.xlu0 %v943_v32  ;;  %s944_s19 = smov 64  }
 0x167   : > { %700 = vmatpush3.bf16.msra.mxu0 %v699_v17  ;;  %706 = vmatpush3.bf16.msra.mxu1 %v705_v18  ;;  %v330_v24 = vld [vmem:[%s329_s3] sm:$0xff]  ;;  %v410_v25 = vld [vmem:[%s409_s17 + $0x8] sm:$0xff]  ;;  %s945_s20 = smov 96   ;;  %s590_s21 = scalar_lea.vmem [#allocation19], %s643_s10 }
 0x168   : > { %739 = vset.pattern.permute.xlu1 %v943_v32  ;;  %s597_s22 = scalar_lea.vmem [#allocation19], %s644_s13  ;;  %s314_s27 = sadd.s32 1, %s926_s27  }
 0x169   : > { %p313_p7 = scmp.ge.s32.totalorder %s314_s27, %s1182_s0 }
 0x16a   : > { %674 = vmatmul.mubr.msk.f32.vlgmr.msra.gmra.mrb[0].mxu0 %vm134_vm1, %v1115_v21  ;;  %685 = vmatmul.mubr.msk.f32.vlgmr.msra.gmra.mrb[0].mxu1 %vm134_vm1, %v1117_v22 }
 0x16b   : > { %521 = vrot.lane.b32.xlu1 %v324_v23, %s942_s28 }
 0x1d8   : > { %v494_v51 = vpop.permute.xlu1 %493 }
 0x1dd   : > { %v522_v53 = vpop.permute.xlu1 %521 }
 0x23d   : > { %v400_v26 = vpop.f32.mrb[0].mxu0  ;;  %v480_v27 = vpop.f32.mrb[0].mxu1 }
 0x23e   : > { %v404_v28 = vadd.f32 %v400_v26, %v330_v24  ;;  %v675_v29 = vpop.f32.mrb[1].mxu0  ;;  %v484_v30 = vadd.f32 %v480_v27, %v410_v25  ;;  %v686_v31 = vpop.f32.mrb[1].mxu1 }
 0x240   : > { %740 = vtanh.f32 %v404_v28  ;;  %v651_v35 = vmul.f32 -1.442695, %v404_v28  ;;  %v652_v36 = vmul.f32 -1.442695, %v484_v30 }
 0x241   : > { %742 = vtanh.f32 %v484_v30 }
 0x242   : > { %744 = vpow2.f32 %v651_v35 }
 0x243   : > { %746 = vpow2.f32 %v652_v36 }
 0x24a   : > { %v741_v33 = vpop.eup %740 }
 0x24b   : > { %498 = vrot.lane.b32.xlu0 %v741_v33, %s944_s19  ;;  %v743_v34 = vpop.eup %742 }
 0x24c   : > { %v745_v37 = vpop.eup %744 }
 0x24d   : > { %v488_v38 = vadd.f32 1.0, %v745_v37  ;;  %v747_v39 = vpop.eup %746 }
 0x24e   : > { %v516_v40 = vadd.f32 1.0, %v747_v39 }
 0x24f   : > { %526 = vrot.lane.b32.xlu0 %v743_v34, %s944_s19  ;;  %748 = vrcp.f32 %v488_v38 }
 0x250   : > { %750 = vrcp.f32 %v516_v40 }
 0x259   : > { %v749_v42 = vpop.eup %748 }
 0x25a   : > { %v751_v46 = vpop.eup %750  ;;  %v496_v52 = vmul.f32 %v749_v42, %v494_v51 }
 0x25b   : > { %v524_v56 = vmul.f32 %v751_v46, %v522_v53 }
 0x2bd   : > { %v499_v43 = vpop.permute.xlu0 %498 }
 0x2be   : > { %v501_v44 = vmul.f32 %v749_v42, %v499_v43 }
 0x2c0   : > { %503 = vrot.lane.b32.xlu0 %v501_v44, %s942_s28 }
 0x2c1   : > { %v527_v47 = vpop.permute.xlu0 %526 }
 0x2c2   : > { %v529_v49 = vmul.f32 %v751_v46, %v527_v47 }
 0x2c4   : > { %547 = vperm.xlu0 %738, %v545_v48   ;;  %531 = vrot.lane.b32.xlu1 %v529_v49, %s942_s28 }
 0x2c8   : > { %567 = vperm.xlu1 %739, %v565_v50  }
 0x332   : > { %v504_v54 = vpop.permute.xlu0 %503 }
 0x333   : > { %v506_v55 = vadd.f32 %v504_v54, %v496_v52 }
 0x335   : > { %752 = vtanh.f32 %v506_v55 }
 0x336   : > { %v532_v57 = vpop.permute.xlu1 %531 }
 0x337   : > { %v534_v58 = vadd.f32 %v532_v57, %v524_v56 }
 0x339   : > { %754 = vtanh.f32 %v534_v58 }
 0x33f   : > { %v753_v59 = vpop.eup %752 }
 0x340   : > { %509 = vrot.lane.b32.xlu1 %v753_v59, %s944_s19 }
 0x343   : > { %v755_v60 = vpop.eup %754  ;;  %v548_v61 = vpop.permute.xlu0 %547 }
 0x344   : > { %vm549_vm5 = vcmp.eq.s32.totalorder %v548_v61, 1  ;;  %550 = vrot.lane.b32.xlu1 %v1115_v21, %s945_s20  ;;  %537 = vrot.lane.b32.xlu0 %v755_v60, %s944_s19 }
 0x345   : > { %v559_v62 = vsel %vm549_vm5, %v506_v55, %v494_v51 }
 0x347   : > { %v568_v63 = vpop.permute.xlu1 %567 }
 0x348   : > { %561 = vrot.lane.b32.xlu1 %v559_v62, %s945_s20  ;;  %570 = vrot.lane.b32.xlu0 %v1117_v22, %s945_s20  ;;  %vm569_vm6 = vcmp.eq.s32.totalorder %v568_v63, 1 }
 0x349   : > { %v579_v16 = vsel %vm569_vm6, %v534_v58, %v522_v53 }
 0x3b2   : > { %v510_v0 = vpop.permute.xlu1 %509 }
 0x3b3   : > { %v512_v10 = vmul.f32 %v749_v42, %v510_v0 }
 0x3b5   : > { %v585_v11 = vsel %vm549_vm5, %v512_v10, 0.0 }
 0x3b6   : > { %587 = vrot.lane.b32.xlu1 %v585_v11, %s942_s28  ;;  %v551_v12 = vpop.permute.xlu1 %550  ;;  %v538_v13 = vpop.permute.xlu0 %537 }
 0x3b7   : > { %v553_v14 = vsel %vm549_vm5, %v512_v10, %v551_v12  ;;  %v540_v15 = vmul.f32 %v751_v46, %v538_v13 }
 0x3b8   : > { %555 = vrot.lane.b32.xlu0 %v553_v14, %s942_s28 }
 0x3b9   : > { %v592_v20 = vsel %vm569_vm6, %v540_v15, 0.0 }
 0x3ba   : > { %v562_v17 = vpop.permute.xlu1 %561  ;;  %581 = vrot.lane.b32.xlu1 %v579_v16, %s945_s20  ;;  %v571_v18 = vpop.permute.xlu0 %570 }
 0x3bb   : > { %564 = vst.msk [vmem:[#allocation4] sm:$0xff] %vm134_vm1, %v562_v17  ;;  %v573_v19 = vsel %vm569_vm6, %v540_v15, %v571_v18 }
 0x3bc   : > { %575 = vrot.lane.b32.xlu0 %v573_v19, %s942_s28 }
 0x3c0   : > { %594 = vrot.lane.b32.xlu0 %v592_v20, %s944_s19 }
 0x428   : > { %v588_v21 = vpop.permute.xlu1 %587 }
 0x429   : > { %591 = vst.msk [vmem:[%s590_s21] sm:$0xff] %vm134_vm1, %v588_v21 }
 0x42a   : > { %v556_v22 = vpop.permute.xlu0 %555 }
 0x42b   : > { %558 = vst.msk [vmem:[#allocation3] sm:$0xff] %vm134_vm1, %v556_v22 }
 0x42c   : > { %v582_v23 = vpop.permute.xlu1 %581 }
 0x42d   : > { %584 = vst.msk [vmem:[#allocation6] sm:$0xff] %vm134_vm1, %v582_v23 }
 0x42e   : > { %v576_v24 = vpop.permute.xlu0 %575 }
 0x42f   : > { %578 = vst.msk [vmem:[#allocation5] sm:$0xff] %vm134_vm1, %v576_v24 }
 0x431   :  { %316 = sbr.rel (!%p313_p7) target bundleno = 353 (0x161), region = 83 }
 0x432   : > { %v595_v25 = vpop.permute.xlu0 %594 }
 0x433   : > { %599 = vst.msk [vmem:[%s597_s22] sm:$0xff] %vm598_vm7, %v595_v25 }
 0x438 PF:  { %s946_s26 = smov [#allocation19]  }
 0x439   :  { %s605_s2 = sshll.u32 %s946_s26, 4  ;;  %s606_s2 = int_to_ptr.vmem [resolvable:$true] %s605_s2 }
 0x43a   :  { %s888_s1 = scalar_lea.vmem %s606_s2, 1024  ;;  %p893_p9 = scmp.lt.s32.totalorder %s606_s2, %s606_s2 }
 0x43b   :  { %p889_p8 = scmp.ne.s32.totalorder %s606_s2, %s888_s1  ;;  %p894_p10 = scmp.lt.s32.totalorder %s888_s1, %s888_s1 }
 0x43d   :  { %p895_p11 = por %p894_p10, %p893_p9 }
 0x43f   :  { %p896_p12 = pnand %p895_p11, %p889_p8 }
 0x441   :  { %899 = shalt.err (!%p896_p12)
}
 0x442   :  { %s900_s6 = scalar_lea.hbm %s1189_s7, 1024 }
 0x443   :  { %p901_p13 = scmp.ne.s32.totalorder %s1189_s7, %s900_s6  ;;  %p904_p0 = scmp.lt.u32.totalorder %s900_s6, %s1189_s7 }
 0x445   :  { %p906_p1 = pnand %p904_p0, %p901_p13 }
 0x447   :  { %909 = shalt.err (!%p906_p1)
}
 0x448   :  { %611 = dma.vmem_to_hbm [thread:$0]  %s606_s2, 1024, %s1189_s7, [#allocation10], %s929_s11, %s929_s11, %s930_s12  }
 0x449   :  { %922 = dma.done.wait [#allocation10], 1024  }
 0x44a   :  { %923 = vsyncadd [#allocation10], 4294966272 }
 0x44b   :  { %615 = vsyncpa [#allocation9], 1 }
 0x44c   :  { %616 = vsyncpa [#allocation12], 1 }
 0x44d   :  { %617 = vsyncpa [#allocation15], 1 }
 0x44e   :  { %618 = vsyncpa [#allocation18], 1 }
 0x44f   :  { %619 = vsyncpa [#allocation10], 1 }

</bundles_post_ra>
